<compile_context>
chip_gen: v5e
topology: v5e:2x2
jax: 0.10.0
libtpu: 0.0.40
codegen_flags: <defaults>
</compile_context>

<pallas_src>
import math

import jax
import jax.numpy as jnp
from jax.experimental import pallas as pl
from jax.experimental.pallas import tpu as pltpu


def _logreg_kernel(x_ref, wt_ref, b_ref, o_ref):
    # x_ref:  (TB, F) VMEM pipelined batch tile
    # wt_ref: (F, 1)  VMEM resident pre-transposed weight (same block every step)
    # b_ref:  (1, 1)  SMEM scalar bias
    # o_ref:  (TB, 1) VMEM output column
    z = jnp.dot(x_ref[...], wt_ref[...], preferred_element_type=jnp.float32)
    z = z + b_ref[0, 0]
    # Numerically stable sigmoid: exp(-|z|) never overflows; exp runs on the EUP.
    e = jnp.exp(-jnp.abs(z))
    sig = jnp.where(z >= 0, 1.0, e) / (1.0 + e)
    o_ref[...] = sig.astype(o_ref.dtype)


def _pick_batch_tile(batch, feat, itemsize, target_tile_bytes=4 << 20):
    """Rows per batch tile.

    * VMEM is budgeted with the lane-padded feature width round_up(F,128):
      a (TB, F) f32 block really occupies TB * round_up(F,128) * 4 bytes.
    * ~4 MiB of x per tile => 2 pipeline buffers = 8 MiB, under the default
      scoped VMEM on v5e (16 MiB) and v6e/v7x (32 MiB).
    * When the batch is big enough, force >= 2 tiles so v7x's two TensorCores
      both get work under dimension_semantics=("parallel",).
    """
    feat_padded = -(-feat // 128) * 128
    bytes_per_row = max(1, feat_padded * itemsize)
    rows = max(8, target_tile_bytes // bytes_per_row)
    if batch >= 16:
        rows = min(rows, batch // 2)          # >= 2 tiles for megacore sharding
    align = 128 if rows >= 128 else 8
    rows = max(8, (rows // align) * align)
    return int(rows)


def _logreg_call(x_arr, w_t, bias_smem, tb, num_tiles, out_rows, parallel=True):
    feat = x_arr.shape[1]
    return pl.pallas_call(
        _logreg_kernel,
        out_shape=jax.ShapeDtypeStruct((out_rows, 1), jnp.float32),
        grid_spec=pltpu.PrefetchScalarGridSpec(
            num_scalar_prefetch=0,
            grid=(num_tiles,),
            in_specs=[
                # x: one (TB, F) batch tile per grid step (double-buffered DMA).
                pl.BlockSpec((tb, feat), lambda i: (i, 0)),
                # pre-transposed weight: identical block every step -> resident.
                pl.BlockSpec((feat, 1), lambda i: (0, 0)),
                # bias: (1, 1) scalar kept in SMEM, out of the VMEM pipeline.
                pl.BlockSpec(memory_space=pltpu.MemorySpace.SMEM),
            ],
            out_specs=pl.BlockSpec((tb, 1), lambda i: (i, 0)),
        ),
        compiler_params=pltpu.CompilerParams(
            dimension_semantics=("parallel" if parallel else "arbitrary",),
        ),
    )(x_arr, w_t, bias_smem)


def logistic_regression(x, weight, bias, *, block_rows=None):
    """Forward pass of LogisticRegression.

    x:      (B, F) float32
    weight: (1, F) float32  (same layout as torch nn.Linear(input_feat, 1).weight)
    bias:   (1,)   float32  (nn.Linear bias)
    returns (B, 1) float32 = sigmoid(x @ weight.T + bias)
    """
    B, F = x.shape
    assert weight.shape == (1, F), weight.shape

    if x.dtype != jnp.float32:
        x = x.astype(jnp.float32)
    # (1, F) -> (F, 1): equivalent to transpose for a single row; tiny copy.
    w_t = jnp.asarray(weight, jnp.float32).reshape(F, 1)
    bias_smem = jnp.asarray(bias, jnp.float32).reshape(1, 1)

    if block_rows is None:
        tb = _pick_batch_tile(B, F, jnp.dtype(jnp.float32).itemsize)
    else:
        tb = int(block_rows)

    num_main = B // tb
    rem = B - num_main * tb

    parts = []
    if num_main > 0:
        # Full x is passed in place; the grid only touches the first num_main*tb
        # rows, so no padding / copying of the big input array is needed.
        parts.append(_logreg_call(x, w_t, bias_smem, tb, num_main, num_main * tb))
    if rem > 0:
        # Ragged tail: copy only the `rem` trailing rows and run a single
        # whole-array-block step (block_shape == full array dims).
        x_tail = jax.lax.slice_in_dim(x, num_main * tb, B, axis=0)
        parts.append(_logreg_call(x_tail, w_t, bias_smem, rem, 1, rem,
                                  parallel=False))

    if len(parts) == 1:
        return parts[0]
    return jnp.concatenate(parts, axis=0)   # only B*4 bytes of output traffic


if __name__ == "__main__":
    key = jax.random.PRNGKey(0)
    kx, kw, kb, kx2, kx3 = jax.random.split(key, 5)

    # Small shapes consistent with the module: batch=8, input_feat=32.
    batch, input_feat = 8, 32
    x = jax.random.normal(kx, (batch, input_feat), dtype=jnp.float32)

    # nn.Linear(input_feat, 1) params (PyTorch default init bound 1/sqrt(F)).
    bound = 1.0 / math.sqrt(input_feat)
    weight = jax.random.uniform(kw, (1, input_feat), jnp.float32, -bound, bound)
    bias = jax.random.uniform(kb, (1,), jnp.float32, -bound, bound)

    out = logistic_regression(x, weight, bias)
    jax.block_until_ready(out)
    ref = jax.nn.sigmoid(x @ weight.T + bias)
    assert out.shape == (batch, 1)
    assert jnp.allclose(out, ref, atol=2e-5, rtol=2e-5)

    # Larger batch exercising the pipelined multi-tile path:
    # 4 grid steps of TB=128 rows, evenly divisible (no tail).
    batch2 = 512
    x2 = jax.random.normal(kx2, (batch2, input_feat), dtype=jnp.float32)
    out2 = logistic_regression(x2, weight, bias, block_rows=128)
    jax.block_until_ready(out2)
    ref2 = jax.nn.sigmoid(x2 @ weight.T + bias)
    assert out2.shape == (batch2, 1)
    assert jnp.allclose(out2, ref2, atol=2e-5, rtol=2e-5)

    # Ragged batch exercising main grid (2 tiles) + tail call (44 rows),
    # i.e. the no-jnp.pad path.
    batch3 = 300
    x3 = jax.random.normal(kx3, (batch3, input_feat), dtype=jnp.float32)
    out3 = logistic_regression(x3, weight, bias, block_rows=128)
    jax.block_until_ready(out3)
    ref3 = jax.nn.sigmoid(x3 @ weight.T + bias)
    assert out3.shape == (batch3, 1)
    assert jnp.allclose(out3, ref3, atol=2e-5, rtol=2e-5)

    # Auto-tiled heuristic path (>= 2 tiles for megacore when batch allows).
    out4 = logistic_regression(x2, weight, bias)
    jax.block_until_ready(out4)
    assert jnp.allclose(out4, ref2, atol=2e-5, rtol=2e-5)

    print("KERNEL_OK")
</pallas_src>

<mosaic_0001>
module attributes {stable_mosaic.version = 11 : i64} {
  func.func @_logreg_kernel(%arg0: i32, %arg1: memref<8x32xf32, #tpu.memory_space<vmem>>, %arg2: memref<32x1xf32, #tpu.memory_space<vmem>>, %arg3: memref<1x1xf32, #tpu.memory_space<smem>>, %arg4: memref<8x1xf32, #tpu.memory_space<vmem>>) attributes {dimension_semantics = [#tpu.dimension_semantics<arbitrary>], iteration_bounds = array<i64: 1>, scalar_prefetch = 0 : i64, scratch_operands = 0 : i64, tpu.core_type = #tpu.core_type<tc>, window_params = [{transform_indices = @transform_0, window_bounds = array<i64: 8, 32>}, {pipeline_mode = #tpu.pipeline_mode<synchronous>, transform_indices = @transform_1, window_bounds = array<i64: 32, 1>}, {transform_indices = @transform_2, window_bounds = array<i64: 1, 1>}, {transform_indices = @transform_3, window_bounds = array<i64: 8, 1>}]} {
    %c0 = arith.constant 0 : index
    %c0_0 = arith.constant 0 : index
    %0 = vector.load %arg1[%c0, %c0_0] : memref<8x32xf32, #tpu.memory_space<vmem>>, vector<8x32xf32>
    %c0_1 = arith.constant 0 : index
    %c0_2 = arith.constant 0 : index
    %1 = vector.load %arg2[%c0_1, %c0_2] : memref<32x1xf32, #tpu.memory_space<vmem>>, vector<32x1xf32>
    %cst = arith.constant dense<0.000000e+00> : vector<8x1xf32>
    %2 = tpu.matmul %0, %1, %cst {dimension_numbers = #tpu.dot_dimension_numbers<[1], [0], [0], [1], [0, 0, 1, 1], [], []>} : vector<8x32xf32>, vector<32x1xf32>, vector<8x1xf32> -> vector<8x1xf32>
    %c0_3 = arith.constant 0 : index
    %c0_4 = arith.constant 0 : index
    %3 = memref.load %arg3[%c0_3, %c0_4] : memref<1x1xf32, #tpu.memory_space<smem>>
    %4 = vector.broadcast %3 : f32 to vector<8x1xf32>
    %5 = arith.addf %2, %4 : vector<8x1xf32>
    %6 = math.absf %5 : vector<8x1xf32>
    %cst_5 = arith.constant 0.000000e+00 : f32
    %7 = vector.broadcast %cst_5 : f32 to vector<8x1xf32>
    %8 = arith.subf %7, %6 : vector<8x1xf32>
    %9 = math.exp %8 : vector<8x1xf32>
    %cst_6 = arith.constant 0.000000e+00 : f32
    %10 = vector.broadcast %cst_6 : f32 to vector<8x1xf32>
    %11 = arith.cmpf oge, %5, %10 : vector<8x1xf32>
    %cst_7 = arith.constant 1.000000e+00 : f32
    %12 = vector.broadcast %cst_7 : f32 to vector<8x1xf32>
    %13 = arith.select %11, %12, %9 : vector<8x1xi1>, vector<8x1xf32>
    %cst_8 = arith.constant 1.000000e+00 : f32
    %14 = vector.broadcast %cst_8 : f32 to vector<8x1xf32>
    %15 = arith.addf %14, %9 : vector<8x1xf32>
    %16 = arith.divf %13, %15 : vector<8x1xf32>
    %c0_9 = arith.constant 0 : index
    %c0_10 = arith.constant 0 : index
    %17 = vector.load %arg4[%c0_9, %c0_10] : memref<8x1xf32, #tpu.memory_space<vmem>>, vector<8x1xf32>
    tpu.vector_store %arg4[%c0_9, %c0_10], %16 {strides = array<i32>} : memref<8x1xf32, #tpu.memory_space<vmem>>, vector<8x1xf32>,
    return
  }
  func.func @transform_0(%arg0: i32) -> (i32, i32) {
    %c0_i32 = arith.constant 0 : i32
    %c0_i32_0 = arith.constant 0 : i32
    return %arg0, %c0_i32 : i32, i32
  }
  func.func @transform_1(%arg0: i32) -> (i32, i32) {
    %c0_i32 = arith.constant 0 : i32
    %c0_i32_0 = arith.constant 0 : i32
    %c0_i32_1 = arith.constant 0 : i32
    return %c0_i32, %c0_i32_0 : i32, i32
  }
  func.func @transform_2(%arg0: i32) -> (i32, i32) {
    %c0_i32 = arith.constant 0 : i32
    %c0_i32_0 = arith.constant 0 : i32
    %c0_i32_1 = arith.constant 0 : i32
    return %c0_i32, %c0_i32_0 : i32, i32
  }
  func.func @transform_3(%arg0: i32) -> (i32, i32) {
    %c0_i32 = arith.constant 0 : i32
    %c0_i32_0 = arith.constant 0 : i32
    return %arg0, %c0_i32 : i32, i32
  }
}

</mosaic_0001>

<bundles_post_ra>
// kernel: tpu_custom_call.1
= control target key start
LH: loop header
LB: loop body
LE: loop exit
PB: predicated region body
PF: predicated region fallthrough
CT: control target
= control target key end

     0   :  { %vm22_vm0 = vcmask 261120   ;;  %vm68_vm6 = vcmask 7168   ;;  %s120_s1 = inlined_call_operand.vmem [shape: f32[32,1], index: 1, kind: input, shape index: {}]   ;;  %s121_s0 = inlined_call_operand.vmem [shape: f32[8,32], index: 0, kind: input, shape index: {}]   ;;  %s122_s2 = inlined_call_operand.<no memory space> [shape: f32[1,1], index: 2, kind: input, shape index: {}]   ;;  %s123_s3 = inlined_call_operand.vmem [shape: f32[8,1], index: 3, kind: output, shape index: {}]  }
   0x1   :  { %v19_v0 = vld [vmem:[%s120_s1 + $0x18] sm:$0xff]  ;;  %v18_v1 = vld [vmem:[%s120_s1 + $0x10] sm:$0xff]  ;;  %v17_v2 = vld [vmem:[%s120_s1 + $0x8] sm:$0xff]  ;;  %v21_v5 = vstv %s122_s2 }
   0x2   :  { %38 = vmatpush.msra.mxu0 %v19_v0  ;;  %v16_v3 = vld [vmem:[%s120_s1] sm:$0xff] }
   0x3   :  { %v15_v4 = vld [vmem:[%s121_s0] sm:$0xff] }
   0x4   :  { %39 = vmatpush.msra.mxu0 %v18_v1 }
   0x6   :  { %40 = vmatpush.msra.mxu0 %v17_v2 }
   0x8   :  { %41 = vmatpush.msra.mxu0 %v16_v3 }
   0x9   :  { %74 = vmatmul.msk.f32.vlgmr.msra.gmra.mxu0 %vm22_vm0, %v15_v4 }
  0x86   :  { %v43_v6 = vpop.f32.mrf.mxu0 }
  0x87   :  { %v44_v7 = vadd.f32 %v43_v6, %v21_v5 }
  0x89   :  { %v46_v8 = vand.u32 2147483647, %v44_v7  ;;  %vm50_vm4 = vcmp.ge.f32.partialorder %v44_v7, 0.0 }
  0x8b   :  { %v47_v9 = vsub.f32 0.0, %v46_v8 }
  0x8d   :  { %v48_v10 = vmul.f32 1.442695, %v47_v9 }
  0x8f   :  { %75 = vpow2.f32 %v48_v10 }
  0x95   :  { %v76_v11 = vpop.eup %75 }
  0x96   :  { %v52_v12 = vadd.f32 1.0, %v76_v11  ;;  %v51_v22 = vsel %vm50_vm4, 1.0, %v76_v11 }
  0x98   :  { %77 = vrcp.f32 %v52_v12  ;;  %v64_v16 = vand.u32 2147483648, %v52_v12  ;;  %v62_v18 = vand.u32 2147483647, %v52_v12  ;;  %vm58_vm2 = vweird.f32 %v52_v12 }
  0x9a   :  { %v65_v20 = vor.u32 1.1754944e-38, %v64_v16  ;;  %vm63_vm5 = vcmp.eq.f32.partialorder %v62_v18, 8.507059e+37 }
  0x9e   :  { %v78_v13 = vpop.eup %77 }
  0x9f   :  { %v54_v14 = vmul.f32 %v78_v13, %v52_v12  ;;  %vm59_vm1 = vweird.f32 %v78_v13 }
  0xa0   :  { %vm60_vm3 = vmor %vm58_vm2, %vm59_vm1 }
  0xa1   :  { %v55_v15 = vsub.f32 1.0, %v54_v14 }
  0xa3   :  { %v56_v17 = vmul.f32 %v78_v13, %v55_v15 }
  0xa5   :  { %v57_v19 = vadd.f32 %v78_v13, %v56_v17 }
  0xa7   :  { %v61_v21 = vsel %vm60_vm3, %v78_v13, %v57_v19 }
  0xa8   :  { %v66_v23 = vsel %vm63_vm5, %v65_v20, %v61_v21 }
  0xa9   :  { %v67_v24 = vmul.f32 %v66_v23, %v51_v22 }
  0xab   :  { %69 = vst.msk [vmem:[%s123_s3] sm:$0xff] %vm68_vm6, %v67_v24 }

</bundles_post_ra>
